<compile_context>
chip_gen: v7x
topology: tpu7x:2x2x1
jax: 0.10.0
libtpu: 0.0.40
codegen_flags: <defaults>
</compile_context>

<pallas_src>
import functools

import jax
import jax.numpy as jnp
from jax import lax
from jax.experimental import pallas as pl
from jax.experimental.pallas import tpu as pltpu


def _round_up(x, m):
    return ((x + m - 1) // m) * m


def _make_fusion_kernel(*, m_true, m_pad, tm_chunk, cache_projection):
    """Builds the kernel for one (batch, query-tile) grid step.

    Refs seen by the kernel:
      src_ref: [1, tN, Dp]    query block (output dtype)
      mem_ref: [1, Mp, Dinp]  padded prompt block (compute dtype)
      w_ref:   [Dinp, Dp]     padded projection weight, stored as W^T
      out_ref: [1, tN, Dp]
      red_ref: VMEM scratch [Mp, Dp] -- projected prompt (compute dtype)
    """
    n_chunks = m_pad // tm_chunk

    def _project(mem_ref, w_ref, red_ref):
        red_ref[...] = jnp.dot(
            mem_ref[0], w_ref[...],
            preferred_element_type=jnp.float32).astype(red_ref.dtype)

    def kernel(src_ref, mem_ref, w_ref, out_ref, red_ref):
        if cache_projection:
            # Project the prompt once per batch (first query tile), reuse the
            # VMEM-cached result for the remaining query tiles of this batch.
            @pl.when(pl.program_id(1) == 0)
            def _():
                _project(mem_ref, w_ref, red_ref)
        else:
            # B == 1 megacore path: recompute per tile so the query-tile axis
            # carries no state and can be split across TensorCores.
            _project(mem_ref, w_ref, red_ref)

        src = src_ref[0]                         # [tN, Dp], output dtype
        q = src.astype(red_ref.dtype)            # MXU operand in compute dtype
        tn_blk, dp = src.shape

        def chunk_step(c, carry):
            m_prev, l_prev, acc_prev = carry
            start = c * tm_chunk
            if not isinstance(c, int):           # dynamic start inside fori_loop
                start = pl.multiple_of(start, tm_chunk)
            red_c = red_ref[pl.ds(start, tm_chunk), :]           # [tM, Dp]

            # scores = q @ red_c^T without materializing a transpose: contract
            # the feature dim of both operands on the MXU, f32 accumulation.
            s = lax.dot_general(
                q, red_c,
                dimension_numbers=(((1,), (1,)), ((), ())),
                preferred_element_type=jnp.float32)              # [tN, tM]

            if m_pad != m_true:
                # Mask padded prompt columns so they do not inflate the softmax.
                col = lax.broadcasted_iota(jnp.int32, s.shape, 1) + c * tm_chunk
                s = jnp.where(col < m_true, s, -jnp.inf)

            # Online-softmax update (all f32 on the VPU/EUP).
            m_new = jnp.maximum(m_prev, jnp.max(s, axis=-1, keepdims=True))
            alpha = jnp.exp(m_prev - m_new)
            p = jnp.exp(s - m_new)                               # [tN, tM]
            l_new = alpha * l_prev + jnp.sum(p, axis=-1, keepdims=True)
            pv = jnp.dot(p.astype(red_c.dtype), red_c,
                         preferred_element_type=jnp.float32)     # [tN, Dp]
            return m_new, l_new, alpha * acc_prev + pv

        carry = (jnp.full((tn_blk, 1), -jnp.inf, dtype=jnp.float32),
                 jnp.zeros((tn_blk, 1), dtype=jnp.float32),
                 jnp.zeros((tn_blk, dp), dtype=jnp.float32))
        if n_chunks <= 4:
            # Short, static chunk count: unroll for LLO scheduler visibility.
            for c in range(n_chunks):
                carry = chunk_step(c, carry)
        else:
            carry = lax.fori_loop(0, n_chunks, chunk_step, carry)
        _, l_fin, acc = carry

        # Exact normalization (no approx reciprocal) -> f32 fidelity vs PyTorch.
        out_ref[0] = (src.astype(jnp.float32) + acc / l_fin).astype(out_ref.dtype)

    return kernel


def fusion_forward(src, prompt, w, *, compute_dtype=None):
    """src: [B, N, Dout], prompt: [B, M, Din], w: [Din, Dout] (== W^T) -> [B, N, Dout].

    compute_dtype: dtype fed to the MXU (default src.dtype for module fidelity);
    pass jnp.bfloat16 for much higher matmul throughput when acceptable.
    """
    B, N, Dout = src.shape
    Bp, M, Din = prompt.shape
    assert Bp == B and w.shape == (Din, Dout)

    if compute_dtype is None:
        compute_dtype = src.dtype
    compute_dtype = jnp.dtype(compute_dtype)
    isz = compute_dtype.itemsize

    # ---- generation-aware VMEM sizing --------------------------------------
    try:
        phys_vmem = int(pltpu.get_tpu_info().vmem_capacity_bytes)
    except Exception:
        phys_vmem = 64 << 20          # conservative: v7x has 64 MiB per TensorCore
    vmem_budget = (phys_vmem * 3) // 4            # ~48 MiB (v7x), ~96 MiB (v5e/v6e)
    max_query_tile = 1024 if phys_vmem > (96 << 20) else 512

    # ---- lane / sublane padding (lane-dense stores, full MXU passes) --------
    LANE = 128
    dp = _round_up(Dout, LANE)
    dinp = _round_up(Din, LANE)
    mp = _round_up(M, LANE)
    tm = max(t for t in (512, 256, 128) if mp % t == 0)   # score-chunk length
    tm = min(tm, mp)

    def vmem_estimate(tn):
        b = 2 * 2 * tn * dp * isz        # src + out blocks (double-buffered)
        b += 2 * mp * dinp * isz         # prompt block (double-buffered)
        b += 2 * dinp * dp * isz         # weight (double-buffered; constant index map)
        b += mp * dp * isz               # projected-prompt scratch
        b += tn * tm * 4 * 2             # score chunk + exp temporaries (f32)
        b += tn * dp * 4 * 2             # accumulator + output temporaries (f32)
        return b

    # Largest query tile that fits the budget, floored at 128 so the MXU still
    # sees full-height passes (per-step overhead ~0.35us makes tiny tiles costly).
    n8 = _round_up(N, 8)
    tn = 128
    for cand in (1024, 512, 256, 128):
        if cand > max_query_tile:
            continue
        tn = cand
        if vmem_estimate(min(cand, n8)) <= vmem_budget:
            break
    tn = min(tn, n8)
    np_ = _round_up(N, tn)               # pad N to a whole number of tiles

    est = vmem_estimate(tn)
    # Never request more than physical VMEM (leave Mosaic internal-scratch headroom).
    vmem_limit = int(min(max(int(1.5 * est), 32 << 20), phys_vmem - (4 << 20)))

    # ---- pad operands (zeros; padded score columns are -inf masked in-kernel) --
    srcp = src
    if (np_, dp) != (N, Dout):
        srcp = jnp.pad(src, ((0, 0), (0, np_ - N), (0, dp - Dout)))
    promptp = prompt.astype(compute_dtype)
    if (mp, dinp) != (M, Din):
        promptp = jnp.pad(promptp, ((0, 0), (0, mp - M), (0, dinp - Din)))
    wp = w.astype(compute_dtype)
    if (dinp, dp) != (Din, Dout):
        wp = jnp.pad(wp, ((0, dinp - Din), (0, dp - Dout)))

    # B >= 2: cache the projection per batch (query-tile axis is "arbitrary").
    # B == 1: recompute per tile so both axes are "parallel" (v7x megacore).
    cache_projection = B >= 2
    n_tiles = np_ // tn
    grid = (B, n_tiles)

    kernel = _make_fusion_kernel(m_true=M, m_pad=mp, tm_chunk=tm,
                                 cache_projection=cache_projection)

    proj_count = 1 if cache_projection else n_tiles
    flops = 2 * B * mp * dinp * dp * proj_count + 4 * B * np_ * mp * dp
    bytes_accessed = (2 * srcp.size * srcp.dtype.itemsize
                      + promptp.size * promptp.dtype.itemsize
                      + wp.size * wp.dtype.itemsize)

    # NOTE: the constant-index weight block is still double-buffered by the
    # pipeline; pl.Buffered(1) on its BlockSpec would reclaim dinp*dp*isz of
    # VMEM -- accounted for in the estimate instead for portability.
    out_p = pl.pallas_call(
        kernel,
        out_shape=jax.ShapeDtypeStruct((B, np_, dp), src.dtype),
        grid_spec=pltpu.PrefetchScalarGridSpec(
            num_scalar_prefetch=0,
            grid=grid,
            in_specs=[
                pl.BlockSpec((1, tn, dp), lambda b, n: (b, n, 0)),
                pl.BlockSpec((1, mp, dinp), lambda b, n: (b, 0, 0)),
                pl.BlockSpec((dinp, dp), lambda b, n: (0, 0)),
            ],
            out_specs=pl.BlockSpec((1, tn, dp), lambda b, n: (b, n, 0)),
            scratch_shapes=[pltpu.VMEM((mp, dp), compute_dtype)],
        ),
        compiler_params=pltpu.CompilerParams(
            dimension_semantics=(
                "parallel", "arbitrary" if cache_projection else "parallel"),
            vmem_limit_bytes=vmem_limit,
        ),
        cost_estimate=pl.CostEstimate(
            flops=int(flops),
            transcendentals=int(B * np_ * mp),
            bytes_accessed=int(bytes_accessed),
        ),
        input_output_aliases={0: 0},     # src tile is read before its out tile is written
    )(srcp, promptp, wp)

    if (np_, dp) != (N, Dout):
        out_p = out_p[:, :N, :Dout]
    return out_p


def fusion_module_forward(features, prompt, w, **kw):
    """Mirrors Fusion.forward: accepts a single feature map or a list of them."""
    if isinstance(features, (list, tuple)):
        return [fusion_forward(f, prompt, w, **kw) for f in features]
    return fusion_forward(features, prompt, w, **kw)


def fusion_reference(src, prompt, w):
    reduced = jnp.einsum("bmi,io->bmo",
                         prompt.astype(src.dtype), w.astype(src.dtype))
    scores = jnp.einsum("bnd,bmd->bnm", src, reduced)
    attn = jax.nn.softmax(scores, axis=-1)
    attn_val = jnp.einsum("bnm,bmd->bnd", attn, reduced)
    return src + attn_val


if __name__ == "__main__":
    # Small shapes consistent with the module: src feature dim == out_dim,
    # prompt feature dim == in_dim.
    B, N, M = 2, 16, 8
    in_dim, out_dim = 32, 32

    key = jax.random.PRNGKey(0)
    k_src, k_prompt, k_w, k_src1 = jax.random.split(key, 4)

    src = jax.random.normal(k_src, (B, N, out_dim), dtype=jnp.float32)
    prompt = jax.random.normal(k_prompt, (B, M, in_dim), dtype=jnp.float32)
    # Deterministic Linear weight (bias=False). Stored as [in_dim, out_dim] == W^T.
    w = (jax.random.uniform(k_w, (in_dim, out_dim), dtype=jnp.float32) - 0.5) \
        * (2.0 / jnp.sqrt(in_dim))

    # B >= 2 path: projection cached per batch in VMEM.
    out = fusion_module_forward(src, prompt, w)
    out = jax.block_until_ready(out)
    ref = fusion_reference(src, prompt, w)
    assert out.shape == (B, N, out_dim)
    assert jnp.allclose(out, ref, atol=1e-4, rtol=1e-4), "mismatch vs reference (B=2)"

    # B == 1 path: projection recomputed per tile, both grid axes parallel.
    src1 = jax.random.normal(k_src1, (1, N, out_dim), dtype=jnp.float32)
    out1 = jax.block_until_ready(fusion_forward(src1, prompt[:1], w))
    ref1 = fusion_reference(src1, prompt[:1], w)
    assert jnp.allclose(out1, ref1, atol=1e-4, rtol=1e-4), "mismatch vs reference (B=1)"

    print("KERNEL_OK")
</pallas_src>

<mosaic_0001>
module attributes {stable_mosaic.version = 11 : i64} {
  func.func @kernel(%arg0: i32, %arg1: i32, %arg2: memref<1x16x128xf32, #tpu.memory_space<vmem>>, %arg3: memref<1x128x128xf32, #tpu.memory_space<vmem>>, %arg4: memref<128x128xf32, #tpu.memory_space<vmem>>, %arg5: memref<1x16x128xf32, #tpu.memory_space<vmem>>, %arg6: memref<128x128xf32, #tpu.memory_space<vmem>>) attributes {dimension_semantics = [#tpu.dimension_semantics<parallel>, #tpu.dimension_semantics<arbitrary>], iteration_bounds = array<i64: 2, 1>, scalar_prefetch = 0 : i64, scratch_operands = 1 : i64, tpu.core_type = #tpu.core_type<tc>, window_params = [{transform_indices = @transform_0, window_bounds = array<i64: 1, 16, 128>}, {transform_indices = @transform_1, window_bounds = array<i64: 1, 128, 128>}, {pipeline_mode = #tpu.pipeline_mode<synchronous>, transform_indices = @transform_2, window_bounds = array<i64: 128, 128>}, {transform_indices = @transform_3, window_bounds = array<i64: 1, 16, 128>}]} {
    %c0_i32 = arith.constant 0 : i32
    %0 = arith.cmpi eq, %arg1, %c0_i32 : i32
    %1 = arith.extui %0 : i1 to i32
    %c0_i32_0 = arith.constant 0 : i32
    %2 = arith.cmpi ne, %1, %c0_i32_0 : i32
    scf.if %2 {
      %c0_16 = arith.constant 0 : index
      %c0_17 = arith.constant 0 : index
      %c0_18 = arith.constant 0 : index
      %39 = vector.load %arg3[%c0_16, %c0_17, %c0_18] : memref<1x128x128xf32, #tpu.memory_space<vmem>>, vector<1x128x128xf32>
      %40 = vector.shape_cast %39 : vector<1x128x128xf32> to vector<128x128xf32>
      %c0_19 = arith.constant 0 : index
      %c0_20 = arith.constant 0 : index
      %41 = vector.load %arg4[%c0_19, %c0_20] : memref<128x128xf32, #tpu.memory_space<vmem>>, vector<128x128xf32>
      %cst_21 = arith.constant dense<0.000000e+00> : vector<128x128xf32>
      %42 = tpu.matmul %40, %41, %cst_21 {dimension_numbers = #tpu.dot_dimension_numbers<[1], [0], [0], [1], [0, 0, 1, 1], [], []>} : vector<128x128xf32>, vector<128x128xf32>, vector<128x128xf32> -> vector<128x128xf32>
      %c0_22 = arith.constant 0 : index
      %c0_23 = arith.constant 0 : index
      %43 = vector.load %arg6[%c0_22, %c0_23] : memref<128x128xf32, #tpu.memory_space<vmem>>, vector<128x128xf32>
      tpu.vector_store %arg6[%c0_22, %c0_23], %42 {strides = array<i32>} : memref<128x128xf32, #tpu.memory_space<vmem>>, vector<128x128xf32>,
    } else {
    }
    %c0 = arith.constant 0 : index
    %c0_1 = arith.constant 0 : index
    %c0_2 = arith.constant 0 : index
    %3 = vector.load %arg2[%c0, %c0_1, %c0_2] : memref<1x16x128xf32, #tpu.memory_space<vmem>>, vector<1x16x128xf32>
    %4 = vector.shape_cast %3 : vector<1x16x128xf32> to vector<16x128xf32>
    %cst = arith.constant 0xFF800000 : f32
    %5 = vector.broadcast %cst : f32 to vector<16x1xf32>
    %cst_3 = arith.constant 0.000000e+00 : f32
    %6 = vector.broadcast %cst_3 : f32 to vector<16x1xf32>
    %cst_4 = arith.constant 0.000000e+00 : f32
    %7 = vector.broadcast %cst_4 : f32 to vector<16x128xf32>
    %c0_5 = arith.constant 0 : index
    %c0_6 = arith.constant 0 : index
    %8 = vector.load %arg6[%c0_5, %c0_6] : memref<128x128xf32, #tpu.memory_space<vmem>>, vector<128x128xf32>
    %cst_7 = arith.constant dense<0.000000e+00> : vector<16x128xf32>
    %9 = tpu.matmul %4, %8, %cst_7 {dimension_numbers = #tpu.dot_dimension_numbers<[1], [1], [0], [0], [0, 0, 1, 0], [], []>} : vector<16x128xf32>, vector<128x128xf32>, vector<16x128xf32> -> vector<16x128xf32>
    %10 = tpu.iota {dimensions = array<i32: 1>} : vector<16x128xi32>
    %c0_i32_8 = arith.constant 0 : i32
    %11 = vector.broadcast %c0_i32_8 : i32 to vector<16x128xi32>
    %12 = arith.addi %10, %11 : vector<16x128xi32>
    %c8_i32 = arith.constant 8 : i32
    %13 = vector.broadcast %c8_i32 : i32 to vector<16x128xi32>
    %14 = arith.cmpi slt, %12, %13 : vector<16x128xi32>
    %cst_9 = arith.constant 0xFF800000 : f32
    %15 = vector.broadcast %cst_9 : f32 to vector<16x128xf32>
    %16 = arith.select %14, %9, %15 : vector<16x128xi1>, vector<16x128xf32>
    %cst_10 = arith.constant dense<0xFF800000> : vector<16xf32>
    %17 = vector.multi_reduction <maximumf>, %16, %cst_10 [1] : vector<16x128xf32> to vector<16xf32>
    %18 = vector.shape_cast %17 : vector<16xf32> to vector<16x1xf32>
    %19 = arith.maximumf %5, %18 : vector<16x1xf32>
    %20 = arith.subf %5, %19 : vector<16x1xf32>
    %21 = math.exp %20 : vector<16x1xf32>
    %22 = vector.broadcast %19 : vector<16x1xf32> to vector<16x128xf32>
    %23 = arith.subf %16, %22 : vector<16x128xf32>
    %24 = math.exp %23 : vector<16x128xf32>
    %25 = arith.mulf %21, %6 : vector<16x1xf32>
    %cst_11 = arith.constant dense<0.000000e+00> : vector<16xf32>
    %26 = vector.multi_reduction <add>, %24, %cst_11 [1] : vector<16x128xf32> to vector<16xf32>
    %27 = vector.shape_cast %26 : vector<16xf32> to vector<16x1xf32>
    %28 = arith.addf %25, %27 : vector<16x1xf32>
    %cst_12 = arith.constant dense<0.000000e+00> : vector<16x128xf32>
    %29 = tpu.matmul %24, %8, %cst_12 {dimension_numbers = #tpu.dot_dimension_numbers<[1], [0], [0], [1], [0, 0, 1, 1], [], []>} : vector<16x128xf32>, vector<128x128xf32>, vector<16x128xf32> -> vector<16x128xf32>
    %30 = vector.broadcast %21 : vector<16x1xf32> to vector<16x128xf32>
    %31 = arith.mulf %30, %7 : vector<16x128xf32>
    %32 = arith.addf %31, %29 : vector<16x128xf32>
    %33 = vector.broadcast %28 : vector<16x1xf32> to vector<16x128xf32>
    %34 = arith.divf %32, %33 : vector<16x128xf32>
    %35 = arith.addf %4, %34 : vector<16x128xf32>
    %c0_13 = arith.constant 0 : index
    %c0_14 = arith.constant 0 : index
    %c0_15 = arith.constant 0 : index
    %36 = vector.load %arg5[%c0_13, %c0_14, %c0_15] : memref<1x16x128xf32, #tpu.memory_space<vmem>>, vector<1x16x128xf32>
    %37 = vector.shape_cast %36 : vector<1x16x128xf32> to vector<16x128xf32>
    %38 = vector.shape_cast %35 : vector<16x128xf32> to vector<1x16x128xf32>
    tpu.vector_store %arg5[%c0_13, %c0_14, %c0_15], %38 {strides = array<i32>} : memref<1x16x128xf32, #tpu.memory_space<vmem>>, vector<1x16x128xf32>,
    return
  }
  func.func @transform_0(%arg0: i32, %arg1: i32) -> (i32, i32, i32) {
    %c0_i32 = arith.constant 0 : i32
    %c0_i32_0 = arith.constant 0 : i32
    return %arg0, %arg1, %c0_i32 : i32, i32, i32
  }
  func.func @transform_1(%arg0: i32, %arg1: i32) -> (i32, i32, i32) {
    %c0_i32 = arith.constant 0 : i32
    %c0_i32_0 = arith.constant 0 : i32
    %c0_i32_1 = arith.constant 0 : i32
    return %arg0, %c0_i32, %c0_i32_0 : i32, i32, i32
  }
  func.func @transform_2(%arg0: i32, %arg1: i32) -> (i32, i32) {
    %c0_i32 = arith.constant 0 : i32
    %c0_i32_0 = arith.constant 0 : i32
    %c0_i32_1 = arith.constant 0 : i32
    return %c0_i32, %c0_i32_0 : i32, i32
  }
  func.func @transform_3(%arg0: i32, %arg1: i32) -> (i32, i32, i32) {
    %c0_i32 = arith.constant 0 : i32
    %c0_i32_0 = arith.constant 0 : i32
    return %arg0, %arg1, %c0_i32 : i32, i32, i32
  }
}

</mosaic_0001>

<bundles_post_ra>
// kernel: tpu_custom_call.1
= control target key start
LH: loop header
LB: loop body
LE: loop exit
PB: predicated region body
PF: predicated region fallthrough
CT: control target
= control target key end

     0   :  { %s1721_s0 = inlined_call_operand.hbm [shape: f32[2,16,128], index: 0, kind: input, shape index: {}, may-alias: {0,3}]   ;;  %s1722_s1 = inlined_call_operand.hbm [shape: f32[2,128,128], index: 1, kind: input, shape index: {}]   ;;  %s1723_s2 = inlined_call_operand.hbm [shape: f32[128,128], index: 2, kind: input, shape index: {}]   ;;  %s1724_s3 = inlined_call_operand.hbm [shape: f32[2,16,128], index: 3, kind: output, shape index: {}, may-alias: {0,3}]  }
   0x1   :  { %1731 = sst [smem:[#allocation15_spill]] %s1721_s0 }
   0x2   :  { %1732 = sst [smem:[#allocation16_spill]] %s1723_s2 }
   0x3   :  { %8 = vsyncpa [#allocation4], 0 }
   0x4   :  { %10 = vsyncpa [#allocation4 + $0x1], 0 }
   0x5   :  { %11 = vsyncpa [#allocation7], 0 }
   0x6   :  { %13 = vsyncpa [#allocation7 + $0x1], 0 }
   0x7   :  { %14 = vsyncpa [#allocation5], 0 }
   0x8   :  { %16 = vsyncpa [#allocation5 + $0x1], 0  ;;  %s1418_s12 = smov 0   ;;  %s1420_s13 = smov 0  }
   0x9   :  { %s1422_s14 = smov 0   ;;  %s1424_s15 = smov 0  }
   0xa   :  { %s1426_s16 = smov 0   ;;  %s1428_s17 = smov 0  }
   0xb LB: > { %s1449_s18 = sadd.s32 4294967295, %s1388_s17   ;;  %s803_s19 = sadd.s32 4294967294, %s1388_s17   ;;  %s1388_s17 = sphi %s1428_s17, %s22_s17   ;;  %s1384_s16 = sphi %s1426_s16, %s1757_s16   ;;  %s1380_s15 = sphi %s1424_s15, %s1756_s15   ;;  %s1376_s14 = sphi %s1422_s14, %s1755_s14   ;;  %s1372_s13 = sphi %s1420_s13, %s1754_s13   ;;  %s1368_s12 = sphi %s1418_s12, %s1753_s12  }
   0xc   : > { %p56_p0 = scmp.ne.s32.totalorder %s1372_s13, %s1368_s12  ;;  %p1725_p1 = scmp.eq.s32.totalorder %s1449_s18, 0 }
   0xd   : > { %p135_p3 = scmp.eq.s32.totalorder %s803_s19, 1  ;;  %p804_p5 = scmp.ge.s32.totalorder %s1388_s17, 1 }
   0xe   : > { %p1458_p4 = por %p1725_p1, %p56_p0  ;;  %p142_p7 = scmp.lt.s32.totalorder %s1388_s17, 3 }
   0xf   : > { %p1463_p6 = por %p135_p3, %p56_p0  ;;  %s1390_s23 = smov [#allocation8]  }
  0x10   : > { %s1733_s20 = scalar_select %p1458_p4, 1, 0 }
  0x11   : > { %s1734_s21 = scalar_select %p1463_p6, 1, 0 }
  0x12   : > { %p1468_p8 = pnand %p804_p5, %p142_p7  ;;  %s154_s24 = sshll.u32 %s1390_s23, 4  ;;  %s155_s24 = int_to_ptr.vmem [resolvable:$true] %s154_s24 }
  0x13   : > { %s34_s26 = sadd.s32 1, %s1384_s16  ;;  %s1737_s2 = sld [smem:[#allocation16_spill]] }
  0x14   : > { %s1735_s22 = scalar_select %p1468_p8, 1, 0 }
  0x15   : > { %p1126_p9 = pneg %p1468_p8 }
  0x17   : > { %p1477_p11 = pnand %p1126_p9, %p1725_p1 }
  0x19   : > { %s1210_s29 = scalar_lea.hbm %s1737_s2, 2048  ;;  %p1212_p13 = pneg %p1477_p11 }
  0x1a   : > { %p1211_p12 = scmp.ne.s32.totalorder %s1737_s2, %s1210_s29  ;;  %p1217_p5 = scmp.lt.u32.totalorder %s1210_s29, %s1737_s2 }
  0x1c   : > { %p1213_p0 = pnand %p1212_p13, %p1211_p12 }
  0x1e   : > { %p1214_p3 = pneg %p1213_p0 }
  0x20   : > { %p1219_p7 = pnand %p1217_p5, %p1214_p3 }
  0x22   : > { %1222 = shalt.err (!%p1219_p7)
}
  0x23   : > { %s1223_s7 = scalar_lea.vmem %s155_s24, 2048  ;;  %p1231_p2 = scmp.lt.s32.totalorder %s155_s24, %s155_s24 }
  0x24   : > { %p1224_p9 = scmp.ne.s32.totalorder %s155_s24, %s1223_s7  ;;  %p1232_p6 = scmp.lt.s32.totalorder %s1223_s7, %s1223_s7 }
  0x26   : > { %p1226_p10 = pnand %p1224_p9, %p1212_p13  ;;  %p1233_p4 = por %p1232_p6, %p1231_p2 }
  0x28   : > { %p1227_p1 = pneg %p1226_p10 }
  0x2a   : > { %p1234_p8 = pnand %p1233_p4, %p1227_p1 }
  0x2c   : > { %1237 = shalt.err (!%p1234_p8)
}
  0x2d   : > { %s1728_s8 = smov 128   ;;  %s1392_s9 = smov 8  }
  0x2e   : > { %1129 = dma.hbm_to_vmem [thread:$0]  (!%p1477_p11), %s1737_s2, 2048, %s155_s24, [#allocation7], %s1728_s8, %s1728_s8, %s1392_s9  }
  0x2f   : > { %p36_p1 = scmp.ge.s32.totalorder %s34_s26, 2  ;;  %s43_s19 = sadd.s32 1, %s1376_s14 }
  0x30   : > { %p50_p2 = scmp.ne.s32.totalorder %s1376_s14, %s1372_s13  ;;  %p51_p4 = scmp.eq.s32.totalorder %s1388_s17, 0 }
  0x31   : > { %s1759_s26 = smov (%p36_p1, %s34_s26), 0  ;;  %p1740_p8 = scmp.eq.s32.totalorder %s1449_s18, 1 }
  0x32   : > { %1738 = sst [smem:[#allocation14_spill]] %s1759_s26  ;;  %p1507_p6 = por %p51_p4, %p50_p2 }
  0x33   : > { %p1513_p10 = por %p1740_p8, %p50_p2  ;;  %s38_s27 = ssub.s32 %s1384_s16, %s1759_s26 }
  0x34   : > { %p1142_p11 = scmp.lt.s32.totalorder %s1388_s17, 2  ;;  %p41_p12 = scmp.eq.s32.totalorder %s38_s27, 0 }
  0x35   : > { %s1521_s24 = sand.u32 1, %s1376_s14   ;;  %s823_s30 = sshll.u32 %s1384_s16, 8 }
  0x36   : > { %s807_s28 = sshll.u32 %s1521_s24, 4  ;;  %s1742_s0 = sld [smem:[#allocation15_spill]] }
  0x37   : > { %s1525_s29 = scalar_select %p41_p12, %s1376_s14, %s43_s19  }
  0x38   : > { %s172_s7 = scalar_lea.vmem [#allocation3], %s807_s28  ;;  %p1537_p13 = pnand %p1142_p11, %p1507_p6 }
  0x39   : > { %s181_s10 = sshll.u32 %s172_s7, 4  ;;  %s810_s27 = sshll.u32 %s1521_s24, 7  ;;  %s1533_s10 = int_to_ptr.vmem [resolvable:$true] %s181_s10 }
  0x3a   : > { %s169_s4 = scalar_lea.sflag [#allocation4], %s1521_s24  ;;  %p1240_p3 = pneg %p1537_p13 }
  0x3c   : > { %s1531_s6 = scalar_lea.hbm %s1742_s0, %s823_s30  ;;  %s1243_s23 = scalar_lea.hbm %s1742_s0, 512 }
  0x3d   : > { %s1238_s30 = scalar_lea.hbm %s1531_s6, 256  ;;  %p1244_p9 = scmp.lt.u32.totalorder %s1531_s6, %s1742_s0 }
  0x3e   : > { %p1239_p0 = scmp.ne.s32.totalorder %s1531_s6, %s1238_s30  ;;  %p1245_p1 = scmp.lt.u32.totalorder %s1243_s23, %s1238_s30 }
  0x3f   : > { %p1247_p4 = scmp.lt.u32.totalorder %s1238_s30, %s1531_s6 }
  0x40   : > { %p1241_p5 = pnand %p1240_p3, %p1239_p0  ;;  %p1246_p2 = por %p1245_p1, %p1244_p9 }
  0x42   : > { %p1242_p7 = pneg %p1241_p5  ;;  %p1248_p6 = por %p1247_p4, %p1246_p2 }
  0x44   : > { %p1249_p8 = pnand %p1248_p6, %p1242_p7 }
  0x46   : > { %1252 = shalt.err (!%p1249_p8)
}
  0x47   : > { %s1253_s19 = scalar_lea.vmem %s1533_s10, 256  ;;  %s1393_s28 = smov [#allocation3]  }
  0x48   : > { %p1254_p11 = scmp.ne.s32.totalorder %s1533_s10, %s1253_s19  ;;  %s1258_s5 = sshll.u32 %s1393_s28, 4  ;;  %s1259_s5 = int_to_ptr.vmem [resolvable:$false] %s1258_s5 }
  0x49   : > { %s1260_s8 = scalar_lea.vmem %s1259_s5, 512  ;;  %p1261_p5 = scmp.lt.s32.totalorder %s1533_s10, %s1259_s5 }
  0x4a   : > { %p1256_p12 = pnand %p1254_p11, %p1240_p3  ;;  %p1262_p9 = scmp.lt.s32.totalorder %s1260_s8, %s1253_s19 }
  0x4c   : > { %p1257_p0 = pneg %p1256_p12  ;;  %p1263_p1 = por %p1262_p9, %p1261_p5 }
  0x4e   : > { %p1264_p2 = pnand %p1263_p1, %p1257_p0 }
  0x50   : > { %1267 = shalt.err (!%p1264_p2)
}
  0x51   : > { %s1744_s30 = smov 128   ;;  %s824_s23 = sshll.u32 %s1384_s16, 11 }
  0x52   : > { %1133 = dma.hbm_to_vmem [thread:$0]  (!%p1537_p13), %s1531_s6, 256, %s1533_s10, %s169_s4, %s1744_s30, %s1744_s30, %s1392_s9  }
  0x53   : > { %s1578_s28 = scalar_lea.hbm %s1722_s1, %s824_s23  ;;  %s195_s5 = scalar_lea.vmem [#allocation6], %s810_s27 }
  0x54   : > { %s202_s8 = sshll.u32 %s195_s5, 4  ;;  %s1745_s0 = sand.u32 1, %s1388_s17   ;;  %s1582_s8 = int_to_ptr.vmem [resolvable:$true] %s202_s8 }
  0x55   : > { %s1586_s2 = scalar_lea.sflag [#allocation7], %s1745_s0  ;;  %s1268_s26 = scalar_lea.hbm %s1578_s28, 2048 }
  0x56   : > { %p1269_p7 = scmp.ne.s32.totalorder %s1578_s28, %s1268_s26  ;;  %s1273_s24 = scalar_lea.hbm %s1722_s1, 4096 }
  0x57   : > { %p1274_p8 = scmp.lt.u32.totalorder %s1578_s28, %s1722_s1  ;;  %p1275_p11 = scmp.lt.u32.totalorder %s1273_s24, %s1268_s26 }
  0x58   : > { %p1271_p4 = pnand %p1269_p7, %p1240_p3  ;;  %p1277_p0 = scmp.lt.u32.totalorder %s1268_s26, %s1578_s28 }
  0x59   : > { %p1276_p12 = por %p1275_p11, %p1274_p8 }
  0x5a   : > { %p1272_p6 = pneg %p1271_p4 }
  0x5b   : > { %p1278_p5 = por %p1277_p0, %p1276_p12 }
  0x5d   : > { %p1279_p9 = pnand %p1278_p5, %p1272_p6 }
  0x5f   : > { %1282 = shalt.err (!%p1279_p9)
}
  0x60   : > { %s1283_s0 = scalar_lea.vmem %s1582_s8, 2048  ;;  %s1394_s27 = smov [#allocation6]  }
  0x61   : > { %p1284_p1 = scmp.ne.s32.totalorder %s1582_s8, %s1283_s0  ;;  %s1288_s7 = sshll.u32 %s1394_s27, 4  ;;  %s1289_s7 = int_to_ptr.vmem [resolvable:$false] %s1288_s7 }
  0x62   : > { %s1290_s19 = scalar_lea.vmem %s1289_s7, 4096  ;;  %p1291_p4 = scmp.lt.s32.totalorder %s1582_s8, %s1289_s7 }
  0x63   : > { %p1286_p2 = pnand %p1284_p1, %p1240_p3  ;;  %p1292_p8 = scmp.lt.s32.totalorder %s1290_s19, %s1283_s0 }
  0x65   : > { %p1287_p7 = pneg %p1286_p2  ;;  %p1293_p11 = por %p1292_p8, %p1291_p4 }
  0x67   : > { %p1294_p12 = pnand %p1293_p11, %p1287_p7 }
  0x69   : > { %1297 = shalt.err (!%p1294_p12)
}
  0x6a   : > { %1136 = dma.hbm_to_vmem [thread:$0]  (!%p1537_p13), %s1578_s28, 2048, %s1582_s8, %s1586_s2, %s1744_s30, %s1744_s30, %s1392_s9  }
  0x6b   : > { %p1746_p3 = scmp.ne.s32.totalorder %s1735_s22, 0 }
  0x6c   : > { %s1618_s26 = sand.u32 (!%p1746_p3), 1, %s1372_s13   ;;  %p1747_p6 = scmp.ne.s32.totalorder (!%p1746_p3), %s1733_s20, 0 }
  0x6d   : > { %214 = sbr.rel (%p1746_p3) target bundleno = 1046 (0x416), region = 32  ;;  %s814_s5 = sshll.u32 (!%p1746_p3), %s1618_s26, 4 }
  0x6e   : > { %s217_s6 = scalar_lea.sflag (!%p1746_p3), [#allocation4], %s1618_s26  ;;  %s1624_s11 = scalar_lea.vmem (!%p1746_p3), [#allocation3], %s814_s5 }
  0x74   : > { %1351 = dma.done.wait (%p1747_p6), %s217_s6, 256  }
  0x75   : > { %1353 = vsyncadd (%p1747_p6), %s217_s6, 4294967040  ;;  %s225_s2 = sand.u32 1, %s1449_s18   ;;  %s815_s22 = sshll.u32 %s1618_s26, 7 }
  0x76   : > { %s226_s9 = scalar_lea.sflag [#allocation7], %s225_s2  ;;  %s1632_s30 = scalar_lea.vmem [#allocation6], %s815_s22 }
  0x77   : > { %1355 = dma.done.wait (%p1747_p6), %s226_s9, 2048  }
  0x78   : > { %1357 = vsyncadd (%p1747_p6), %s226_s9, 4294965248  ;;  %p1748_p13 = scmp.eq.s32.totalorder %s1449_s18, 0 }
  0x7a   : > { %1359 = dma.done.wait (%p1748_p13), [#allocation7], 2048   ;;  %p1749_p0 = pmov %p1748_p13 }
  0x7b   : > { %v283_v0 = vld [vmem:[#allocation8] sm:$0xff]  ;;  %v284_v1 = vld [vmem:[#allocation8 + $0x8] sm:$0xff]  ;;  %v285_v2 = vld [vmem:[#allocation8 + $0x10] sm:$0xff]  ;;  %s260_s18 = scalar_lea.vmem [#allocation9], %s814_s5  ;;  %s825_s28 = sshll.u32 %s1380_s15, 8 }
  0x7c   : > { %1361 = vsyncadd (%p1749_p0), [#allocation7], 4294965248  ;;  %v1020_v3 = vpack.c.bf16 %v284_v1, %v283_v0  ;;  %v286_v4 = vld [vmem:[#allocation8 + $0x18] sm:$0xff]  ;;  %v287_v6 = vld [vmem:[#allocation8 + $0x20] sm:$0xff]  ;;  %s683_s20 = sshll.u32 %s260_s18, 4  ;;  %s1671_s24 = scalar_lea.hbm %s1724_s3, %s825_s28  ;;  %s1666_s20 = int_to_ptr.vmem [resolvable:$true] %s683_s20 }
  0x7d   : > { %v1024_v5 = vpack.c.bf16 %v286_v4, %v285_v2  ;;  %v288_v7 = vld [vmem:[#allocation8 + $0x28] sm:$0xff]  ;;  %v267_v9 = vld [vmem:[%s1632_s30] sm:$0xff]  ;;  %v289_v10 = vld [vmem:[#allocation8 + $0x30] sm:$0xff]  ;;  %v553_v2 = vlaneseq  ;;  %s668_s4 = scalar_lea.sflag [#allocation5], %s1618_s26  ;;  %s1298_s15 = scalar_lea.vmem %s1666_s20, 256 }
  0x7e   : > { %1021 = vmatprep.subr.bf16.mxu0 %v1020_v3  ;;  %v1028_v8 = vpack.c.bf16 %v288_v7, %v287_v6  ;;  %v290_v11 = vld [vmem:[#allocation8 + $0x38] sm:$0xff]  ;;  %926 = vmatprep.mubr.f32.mxu0 %v267_v9  ;;  %v291_v13 = vld [vmem:[#allocation8 + $0x40] sm:$0xff]  ;;  %v292_v14 = vld [vmem:[#allocation8 + $0x48] sm:$0xff]  ;;  %p1299_p5 = scmp.ne.s32.totalorder %s1666_s20, %s1298_s15  ;;  %s1395_s23 = smov [#allocation9]  }
  0x7f   : > { %1023 = vmatpush3.bf16.msra.mxu0 %v1020_v3  ;;  %v1032_v12 = vpack.c.bf16 %v290_v11, %v289_v10  ;;  %v1036_v15 = vpack.c.bf16 %v292_v14, %v291_v13  ;;  %v293_v16 = vld [vmem:[#allocation8 + $0x50] sm:$0xff]  ;;  %v294_v17 = vld [vmem:[#allocation8 + $0x58] sm:$0xff]  ;;  %v295_v19 = vld [vmem:[#allocation8 + $0x60] sm:$0xff]  ;;  %v554_v3 = vand.u32 127, %v553_v2  ;;  %s1302_s0 = sshll.u32 %s1395_s23, 4  ;;  %s1303_s0 = int_to_ptr.vmem [resolvable:$false] %s1302_s0 }
  0x80   : > { %1025 = vmatprep.subr.bf16.mxu0 %v1024_v5  ;;  %v1040_v18 = vpack.c.bf16 %v294_v17, %v293_v16  ;;  %v296_v20 = vld [vmem:[#allocation8 + $0x68] sm:$0xff]  ;;  %v297_v22 = vld [vmem:[#allocation8 + $0x70] sm:$0xff]  ;;  %v298_v23 = vld [vmem:[#allocation8 + $0x78] sm:$0xff]  ;;  %p1300_p9 = pnand %p1299_p5, %p1513_p10  ;;  %s1304_s27 = scalar_lea.vmem %s1303_s0, 512 }
  0x81   : > { %v1044_v21 = vpack.c.bf16 %v296_v20, %v295_v19  ;;  %v1048_v24 = vpack.c.bf16 %v298_v23, %v297_v22  ;;  %v268_v25 = vld [vmem:[%s1632_s30 + $0x8] sm:$0xff]  ;;  %v269_v26 = vld [vmem:[%s1632_s30 + $0x10] sm:$0xff]  ;;  %v270_v27 = vld [vmem:[%s1632_s30 + $0x18] sm:$0xff]  ;;  %vm555_vm0 = vcmp.lt.s32.totalorder %v554_v3, 8  ;;  %p1305_p2 = scmp.lt.s32.totalorder %s1666_s20, %s1303_s0  ;;  %p1306_p7 = scmp.lt.s32.totalorder %s1304_s27, %s1298_s15 }
  0x82   : > { %v271_v28 = vld [vmem:[%s1632_s30 + $0x20] sm:$0xff]  ;;  %v272_v29 = vld [vmem:[%s1632_s30 + $0x28] sm:$0xff]  ;;  %v273_v30 = vld [vmem:[%s1632_s30 + $0x30] sm:$0xff]  ;;  %p1301_p1 = pneg %p1300_p9 }
  0x83   : > { %1027 = vmatpush3.bf16.msra.mxu0 %v1024_v5  ;;  %v274_v31 = vld [vmem:[%s1632_s30 + $0x38] sm:$0xff]  ;;  %v275_v32 = vld [vmem:[%s1632_s30 + $0x40] sm:$0xff]  ;;  %v276_v33 = vld [vmem:[%s1632_s30 + $0x48] sm:$0xff]  ;;  %p1307_p4 = por %p1306_p7, %p1305_p2 }
  0x84   : > { %1029 = vmatprep.subr.bf16.mxu0 %v1028_v8  ;;  %v277_v34 = vld [vmem:[%s1632_s30 + $0x50] sm:$0xff]  ;;  %v278_v35 = vld [vmem:[%s1632_s30 + $0x58] sm:$0xff]  ;;  %v279_v36 = vld [vmem:[%s1632_s30 + $0x60] sm:$0xff] }
  0x85   : > { %v280_v37 = vld [vmem:[%s1632_s30 + $0x68] sm:$0xff]  ;;  %v281_v38 = vld [vmem:[%s1632_s30 + $0x70] sm:$0xff]  ;;  %v282_v39 = vld [vmem:[%s1632_s30 + $0x78] sm:$0xff]  ;;  %p1308_p8 = pnand %p1307_p4, %p1301_p1 }
  0x86   : > { %v1659_v40 = vld [vmem:[%s1624_s11] sm:$0xff]  ;;  %v461_v1 = vld [vmem:[%s1624_s11 + $0x8] sm:$0xff] }
  0x87   : > { %1031 = vmatpush3.bf16.msra.mxu0 %v1028_v8  ;;  %982 = vmatprep.mubr.f32.mxu1 %v1659_v40 }
  0x88   : > { %1033 = vmatprep.subr.bf16.mxu0 %v1032_v12 }
  0x8b   : > { %1035 = vmatpush3.bf16.msra.mxu0 %v1032_v12 }
  0x8c   : > { %1037 = vmatprep.subr.bf16.mxu0 %v1036_v15 }
  0x8f   : > { %1039 = vmatpush3.bf16.msra.mxu0 %v1036_v15 }
  0x90   : > { %1041 = vmatprep.subr.bf16.mxu0 %v1040_v18 }
  0x93   : > { %1043 = vmatpush3.bf16.msra.mxu0 %v1040_v18 }
  0x94   : > { %1045 = vmatprep.subr.bf16.mxu0 %v1044_v21 }
  0x97   : > { %1047 = vmatpush3.bf16.msra.mxu0 %v1044_v21 }
  0x98   : > { %1049 = vmatprep.subr.bf16.mxu0 %v1048_v24 }
  0x9b   : > { %1051 = vmatpush3.bf16.msra.mxu0 %v1048_v24 }
  0x9e   : > { %927 = vmatmul.mubr.f32.vlgmr.msra.gmra.mrb[0].mxu0 %v268_v25 }
  0x9f   : > { %929 = vmatprep.mubr.f32.mxu0 %v269_v26 }
  0xa2   : > { %930 = vmatmul.mubr.f32.gmra.mrb[2].mxu0 %v270_v27 }
  0xa3   : > { %932 = vmatprep.mubr.f32.mxu0 %v271_v28 }
  0xa6   : > { %933 = vmatmul.mubr.f32.gmra.mrb[4].mxu0 %v272_v29 }
  0xa7   : > { %935 = vmatprep.mubr.f32.mxu0 %v273_v30 }
  0xaa   : > { %936 = vmatmul.mubr.f32.gmra.mrb[6].mxu0 %v274_v31 }
  0xab   : > { %938 = vmatprep.mubr.f32.mxu0 %v275_v32 }
  0xae   : > { %939 = vmatmul.mubr.f32.gmra.mrb[8].mxu0 %v276_v33 }
  0xaf   : > { %941 = vmatprep.mubr.f32.mxu0 %v277_v34 }
  0xb2   : > { %942 = vmatmul.mubr.f32.gmra.mrb[10].mxu0 %v278_v35 }
  0xb3   : > { %944 = vmatprep.mubr.f32.mxu0 %v279_v36 }
  0xb6   : > { %945 = vmatmul.mubr.f32.gmra.mrb[12].mxu0 %v280_v37 }
  0xb7   : > { %947 = vmatprep.mubr.f32.mxu0 %v281_v38 }
  0xba   : > { %948 = vmatmul.mubr.f32.gmra.mrb[14].mxu0 %v282_v39 }
 0x171   : > { %v928_v41 = vpop.f32.mrb[0].mxu0 }
 0x172   : > { %v365_v42 = vpop.f32.mrb[1].mxu0 }
 0x173   : > { %v1052_v43 = vpack.c.bf16 %v928_v41, %v365_v42 }
 0x175   : > { %1053 = vmatprep.subr.bf16.mxu1 %v1052_v43  ;;  %1085 = vmatprep.subr.bf16.mxu0 %v1052_v43  ;;  %v931_v44 = vpop.f32.mrb[2].mxu0 }
 0x176   : > { %1055 = vmatpush3.bf16.xpose.msra.mxu1 %v1052_v43  ;;  %1087 = vmatpush3.bf16.msra.mxu0 %v1052_v43  ;;  %v375_v45 = vpop.f32.mrb[3].mxu0 }
 0x177   : > { %v1056_v46 = vpack.c.bf16 %v931_v44, %v375_v45 }
 0x179   : > { %1089 = vmatprep.subr.bf16.mxu0 %v1056_v46  ;;  %1057 = vmatprep.subr.bf16.mxu1 %v1056_v46  ;;  %v934_v47 = vpop.f32.mrb[4].mxu0 }
 0x17a   : > { %1091 = vmatpush3.bf16.msra.mxu0 %v1056_v46  ;;  %v385_v48 = vpop.f32.mrb[5].mxu0 }
 0x17b   : > { %v1060_v49 = vpack.c.bf16 %v934_v47, %v385_v48 }
 0x17d   : > { %1093 = vmatprep.subr.bf16.mxu0 %v1060_v49  ;;  %v937_v50 = vpop.f32.mrb[6].mxu0 }
 0x17e   : > { %1059 = vmatpush3.bf16.xpose.msra.mxu1 %v1056_v46  ;;  %1095 = vmatpush3.bf16.msra.mxu0 %v1060_v49  ;;  %v395_v51 = vpop.f32.mrb[7].mxu0 }
 0x17f   : > { %1061 = vmatprep.subr.bf16.mxu1 %v1060_v49  ;;  %v1064_v52 = vpack.c.bf16 %v937_v50, %v395_v51 }
 0x181   : > { %1097 = vmatprep.subr.bf16.mxu0 %v1064_v52  ;;  %v940_v53 = vpop.f32.mrb[8].mxu0 }
 0x182   : > { %1099 = vmatpush3.bf16.msra.mxu0 %v1064_v52  ;;  %v405_v54 = vpop.f32.mrb[9].mxu0 }
 0x183   : > { %v1068_v55 = vpack.c.bf16 %v940_v53, %v405_v54 }
 0x185   : > { %1101 = vmatprep.subr.bf16.mxu0 %v1068_v55  ;;  %v943_v56 = vpop.f32.mrb[10].mxu0 }
 0x186   : > { %1063 = vmatpush3.bf16.xpose.msra.mxu1 %v1060_v49  ;;  %1103 = vmatpush3.bf16.msra.mxu0 %v1068_v55  ;;  %v415_v57 = vpop.f32.mrb[11].mxu0 }
 0x187   : > { %1065 = vmatprep.subr.bf16.mxu1 %v1064_v52  ;;  %v1072_v58 = vpack.c.bf16 %v943_v56, %v415_v57 }
 0x189   : > { %1105 = vmatprep.subr.bf16.mxu0 %v1072_v58  ;;  %v946_v59 = vpop.f32.mrb[12].mxu0 }
 0x18a   : > { %1107 = vmatpush3.bf16.msra.mxu0 %v1072_v58  ;;  %v425_v60 = vpop.f32.mrb[13].mxu0 }
 0x18b   : > { %v1076_v61 = vpack.c.bf16 %v946_v59, %v425_v60 }
 0x18d   : > { %1109 = vmatprep.subr.bf16.mxu0 %v1076_v61  ;;  %v949_v62 = vpop.f32.mrb[14].mxu0 }
 0x18e   : > { %1067 = vmatpush3.bf16.xpose.msra.mxu1 %v1064_v52  ;;  %1111 = vmatpush3.bf16.msra.mxu0 %v1076_v61  ;;  %v435_v63 = vpop.f32.mrb[15].mxu0 }
 0x18f   : > { %1069 = vmatprep.subr.bf16.mxu1 %v1068_v55  ;;  %v1080_v0 = vpack.c.bf16 %v949_v62, %v435_v63 }
 0x191   : > { %1113 = vmatprep.subr.bf16.mxu0 %v1080_v0 }
 0x192   : > { %1115 = vmatpush3.bf16.msra.mxu0 %v1080_v0 }
 0x196   : > { %1071 = vmatpush3.bf16.xpose.msra.mxu1 %v1068_v55 }
 0x197   : > { %1073 = vmatprep.subr.bf16.mxu1 %v1072_v58 }
 0x19e   : > { %1075 = vmatpush3.bf16.xpose.msra.mxu1 %v1072_v58 }
 0x19f   : > { %1077 = vmatprep.subr.bf16.mxu1 %v1076_v61 }
 0x1a6   : > { %1079 = vmatpush3.bf16.xpose.msra.mxu1 %v1076_v61 }
 0x1a7   : > { %1081 = vmatprep.subr.bf16.mxu1 %v1080_v0 }
 0x1ae   : > { %1083 = vmatpush3.bf16.xpose.msra.mxu1 %v1080_v0 }
 0x1b5   : > { %983 = vmatmul.mubr.f32.vlgmr.msra.gmra.mrb[0].mxu1 %v461_v1 }
 0x288   : > { %v984_v4 = vpop.f32.mrb[0].mxu1 }
 0x289   : > { %v544_v5 = vpop.f32.mrb[1].mxu1  ;;  %v557_v7 = vsel %vm555_vm0, %v984_v4, -inf }
 0x28a   : > { %v556_v6 = vsel %vm555_vm0, %v544_v5, -inf }
 0x28b   : > { %558 = vmax.xlane.f32.xlu0 %v556_v6 }
 0x28f   : > { %560 = vmax.xlane.f32.xlu0 %v557_v7 }
 0x318   : > { %v559_v8 = vpop.xlane.xlu0 %558 }
 0x319   : > { %v568_v9 = vsub.f32 %v556_v6, %v559_v8  ;;  %v562_v17 = vsub.f32 -inf, %v559_v8 }
 0x31b   : > { %v570_v10 = vmul.f32 1.442695, %v568_v9  ;;  %v564_v19 = vmul.f32 1.442695, %v562_v17 }
 0x31c   : > { %v561_v11 = vpop.xlane.xlu0 %560 }
 0x31d   : > { %v569_v12 = vsub.f32 %v557_v7, %v561_v11  ;;  %1198 = vpow2.f32 %v570_v10  ;;  %v563_v16 = vsub.f32 -inf, %v561_v11 }
 0x31f   : > { %v572_v13 = vmul.f32 1.442695, %v569_v12  ;;  %v566_v18 = vmul.f32 1.442695, %v563_v16 }
 0x321   : > { %1200 = vpow2.f32 %v572_v13 }
 0x322   : > { %1202 = vpow2.f32 %v566_v18 }
 0x323   : > { %1204 = vpow2.f32 %v564_v19 }
 0x327   : > { %v1199_v14 = vpop.eup %1198 }
 0x328   : > { %576 = vadd.xlane.f32.xlu1 %v1199_v14  ;;  %1017 = vmatprep.mubr.f32.mxu0 %v1199_v14 }
 0x32b   : > { %v1201_v15 = vpop.eup %1200 }
 0x32c   : > { %578 = vadd.xlane.f32.xlu1 %v1201_v15  ;;  %1018 = vmatmul.mubr.f32.vlgmr.msra.gmra.mrb[16].mxu0 %v1201_v15  ;;  %v1203_v21 = vpop.eup %1202 }
 0x32d   : > { %v1205_v22 = vpop.eup %1204  ;;  %v575_v24 = vmul.f32 0.0, %v1203_v21 }
 0x32e   : > { %v574_v25 = vmul.f32 0.0, %v1205_v22 }
 0x3b5   : > { %v577_v20 = vpop.xlane.xlu1 %576 }
 0x3b6   : > { %v580_v27 = vadd.f32 %v577_v20, %v574_v25 }
 0x3b9   : > { %v579_v23 = vpop.xlane.xlu1 %578 }
 0x3ba   : > { %v581_v26 = vadd.f32 %v579_v23, %v575_v24 }
 0x3bc   : > { %1206 = vrcp.f32 %v581_v26 }
 0x3bd   : > { %1208 = vrcp.f32 %v580_v27 }
 0x3c6   : > { %v1207_v31 = vpop.eup %1206 }
 0x3c7   : > { %v1209_v33 = vpop.eup %1208 }
 0x3ff   : > { %v1019_v28 = vpop.f32.mrb[16].mxu0 }
 0x400   : > { %v658_v29 = vadd.f32 %v1019_v28, %v575_v24  ;;  %v648_v30 = vpop.f32.mrb[17].mxu0 }
 0x401   : > { %v657_v32 = vadd.f32 %v648_v30, %v574_v25 }
 0x402   : > { %v662_v34 = vmul.f32 %v1207_v31, %v658_v29 }
 0x403   : > { %v660_v35 = vmul.f32 %v1209_v33, %v657_v32 }
 0x404   : > { %v664_v36 = vadd.f32 %v662_v34, %v461_v1 }
 0x405   : > { %v663_v37 = vadd.f32 %v660_v35, %v1659_v40 }
 0x406   : > { %666 = vst [vmem:[%s260_s18 + $0x8] sm:$0xff] %v664_v36 }
 0x407   : > { %665 = vst [vmem:[%s260_s18] sm:$0xff] %v663_v37 }
 0x408   : > { %1311 = shalt.err (!%p1308_p8)
}
 0x409   : > { %s1312_s7 = scalar_lea.hbm %s1671_s24, 256  ;;  %s1316_s6 = scalar_lea.hbm %s1724_s3, 512 }
 0x40a   : > { %p1313_p11 = scmp.ne.s32.totalorder %s1671_s24, %s1312_s7  ;;  %p1317_p6 = scmp.lt.u32.totalorder %s1671_s24, %s1724_s3 }
 0x40b   : > { %p1318_p13 = scmp.lt.u32.totalorder %s1316_s6, %s1312_s7  ;;  %p1320_p5 = scmp.lt.u32.totalorder %s1312_s7, %s1671_s24 }
 0x40c   : > { %p1314_p12 = pnand %p1313_p11, %p1513_p10 }
 0x40d   : > { %p1319_p0 = por %p1318_p13, %p1317_p6 }
 0x40e   : > { %p1315_p3 = pneg %p1314_p12 }
 0x40f   : > { %p1321_p9 = por %p1320_p5, %p1319_p0 }
 0x411   : > { %p1322_p1 = pnand %p1321_p9, %p1315_p3 }
 0x413   : > { %1325 = shalt.err (!%p1322_p1)
}
 0x414   : > { %s1396_s22 = smov 128   ;;  %s1397_s9 = smov 8  }
 0x415   : > { %1124 = dma.vmem_to_hbm [thread:$0]  (%p1513_p10), %s1666_s20, 256, %s1671_s24, %s668_s4, %s1396_s22, %s1396_s22, %s1397_s9  }
 0x416 PF: > { %s698_s30 = sand.u32 1, %s1368_s12   ;;  %p1750_p2 = scmp.ne.s32.totalorder %s1734_s21, 0 }
 0x417   : > { %p1751_p7 = scmp.ge.s32.totalorder %s1388_s17, 2  ;;  %s699_s18 = scalar_lea.sflag [#allocation5], %s698_s30 }
 0x419   : > { %p1138_p4 = pnand %p1751_p7, %p1750_p2 }
 0x41b   : > { %1363 = dma.done.wait (!%p1138_p4), %s699_s18, 256  }
 0x41c   : > { %1365 = vsyncadd (!%p1138_p4), %s699_s18, 4294967040  ;;  %s22_s17 = sadd.s32 1, %s1388_s17   ;;  %s1752_s25 = sld [smem:[#allocation14_spill]] }
 0x41d   : > { %p19_p8 = scmp.ge.s32.totalorder %s22_s17, 4   ;;  %s1753_s12 = smov %s1372_s13 }
 0x41e   : > { %s1754_s13 = smov %s1376_s14  ;;  %s1755_s14 = smov %s1525_s29 }
 0x41f   : > { %s1756_s15 = smov %s1384_s16  ;;  %21 = sbr.rel (!%p19_p8) target bundleno = 11 (0xb), region = 98 }
 0x422   : > { %s1757_s16 = smov %s1752_s25 }
 0x426   :  { %704 = vsyncpa [#allocation4], 1 }
 0x427   :  { %706 = vsyncpa [#allocation4 + $0x1], 1 }
 0x428   :  { %707 = vsyncpa [#allocation7], 1 }
 0x429   :  { %709 = vsyncpa [#allocation7 + $0x1], 1 }
 0x42a   :  { %710 = vsyncpa [#allocation5], 1 }
 0x42b   :  { %712 = vsyncpa [#allocation5 + $0x1], 1 }

</bundles_post_ra>
